<compile_context>
chip_gen: v7x
topology: tpu7x:2x2x1
jax: 0.10.0
libtpu: 0.0.40
codegen_flags: <defaults>
</compile_context>

<pallas_src>
import functools

import jax
import jax.numpy as jnp
from jax.experimental import pallas as pl
from jax.experimental.pallas import tpu as pltpu


def last_block_kernel(x_ref, wconv_ref, wlin_ref, blin_ref, out_ref, win_ref, *,
                      kernel_size, dilation, t_tile, halo, batch_block,
                      num_t_tiles, matmul_dtype):
    """One (batch-block, time-tile) grid step in NCT layout.

    x_ref    : (Bb, C, T_tile)        input tile (channels on sublanes, time on lanes)
    wconv_ref: (C, K)                 depthwise taps; residual folded into tap K-1
    wlin_ref : (C, C)                 linear weight (out = W @ y), matmul_dtype
    blin_ref : (C, 1)                 linear bias + W @ conv_bias (f32)
    out_ref  : (Bb, C, T_tile)
    win_ref  : (Bb, C, halo+T_tile)   f32 window scratch; lanes [halo-pad, halo)
                                      carry the causal tail of the previous tile
    """
    pad = (kernel_size - 1) * dilation
    C = x_ref.shape[1]

    x_f32 = x_ref[...].astype(jnp.float32)                # (Bb, C, T_tile)
    w = wconv_ref[...].astype(jnp.float32)                 # (C, K), read once

    if pad > 0:
        t_idx = pl.program_id(1)

        @pl.when(t_idx == 0)
        def _():
            # First time tile of each batch block: causal left pad is zeros.
            win_ref[:, :, :halo] = jnp.zeros((batch_block, C, halo),
                                             dtype=win_ref.dtype)

        # Single lane-aligned store of the tile at offset `halo`; the taps
        # below are static shifted loads from this scratch (no concat copies).
        win_ref[:, :, halo:halo + t_tile] = x_f32

        acc = None
        for k in range(kernel_size):                       # K is small & static
            start = halo - pad + k * dilation
            tap = win_ref[:, :, start:start + t_tile]      # (Bb, C, T_tile) f32
            term = tap * w[None, :, k:k + 1]
            acc = term if acc is None else acc + term

        if num_t_tiles > 1:
            # Carry this tile's causal tail for the next time tile (the write
            # is ordered after the tap reads above).
            win_ref[:, :, halo - pad:halo] = x_f32[:, :, t_tile - pad:]
    else:
        # pad == 0  =>  kernel_size == 1: depthwise conv is a pure per-channel
        # scale (residual already folded into the single tap).
        acc = x_f32 * w[None, :, 0:1]

    # Pointwise linear over channels: one wide MXU matmul for the whole fused
    # batch block, out = W @ [y_0 | y_1 | ...] + b, f32 accumulation.
    if batch_block > 1:
        acc_cat = jnp.concatenate([acc[bb] for bb in range(batch_block)],
                                  axis=-1)                 # (C, Bb*T_tile)
    else:
        acc_cat = acc[0]

    out_cat = jnp.dot(wlin_ref[...], acc_cat.astype(matmul_dtype),
                      preferred_element_type=jnp.float32)
    out_cat = out_cat + blin_ref[...]
    for bb in range(batch_block):
        out_ref[bb] = out_cat[:, bb * t_tile:(bb + 1) * t_tile].astype(out_ref.dtype)


def _vmem_capacity_bytes():
    try:
        cap = getattr(pltpu.get_tpu_info(), "vmem_capacity_bytes", None)
        if cap:
            return int(cap)
    except Exception:
        pass
    return 64 << 20   # conservative: v7x per-TensorCore VMEM


def _choose_t_tile(T, pad):
    for cand in (4096, 2048, 1024, 512, 256, 128):
        if T % cand == 0 and cand >= pad:
            return cand
    return T


def _choose_batch_block(B, C, t_tile, itemsize, target_bytes=2 << 20, max_bb=8):
    if t_tile % 128 != 0:          # lane-aligned concat/split needed for Bb > 1
        return 1
    per_row = max(C * t_tile * itemsize, 1)
    want = max(1, min(max_bb, target_bytes // per_row))
    bb = 1
    for cand in range(2, min(B, max_bb) + 1):
        if B % cand == 0 and cand <= want:
            bb = cand
    return bb


def last_block_forward(x, wconv, bconv, wlin, blin, *, kernel_size, dilation,
                       t_tile=None, batch_block=None,
                       matmul_dtype=jnp.bfloat16, io_dtype=None):
    """x: (B, C, T) in PyTorch NCT layout. Returns (B, C, T).

    wconv: (C, 1, K) depthwise Conv1d weight, bconv: (C,)
    wlin : (C, C) Linear weight, blin: (C,)
    io_dtype: if set (e.g. jnp.bfloat16), HBM I/O happens in that dtype; the
              in-kernel conv math and matmul accumulation remain f32.
    """
    B, C, T = x.shape
    pad = (kernel_size - 1) * dilation
    # TODO(synk): stride != 1 has no residual-compatible output shape; stride == 1 assumed.

    out_dtype = io_dtype if io_dtype is not None else x.dtype
    if io_dtype is not None and x.dtype != io_dtype:
        x = x.astype(io_dtype)           # bandwidth-bound regime: halve HBM bytes
    x_item = jnp.dtype(x.dtype).itemsize
    mm_item = jnp.dtype(matmul_dtype).itemsize

    budget = max(int(0.7 * _vmem_capacity_bytes()), 16 << 20)

    auto_tile = t_tile is None
    if auto_tile:
        t_tile = _choose_t_tile(T, pad)
    assert T % t_tile == 0, "T_tile must divide T"
    assert t_tile % 128 == 0 or t_tile == T, "T_tile must be lane-aligned or full"
    num_t_tiles = T // t_tile
    if num_t_tiles > 1:
        assert t_tile >= pad, "carried halo requires T_tile >= (K-1)*dilation"

    auto_bb = batch_block is None
    if auto_bb:
        batch_block = _choose_batch_block(B, C, t_tile, x_item)
    assert B % batch_block == 0, "batch_block must divide B"
    if batch_block > 1:
        assert t_tile % 128 == 0, "batch_block > 1 needs lane-aligned T_tile"

    halo = 0 if pad == 0 else max(128, -(-pad // 128) * 128)   # lane-aligned halo

    def est(bb, tt):
        blk = bb * C * tt
        return (4 * blk * x_item                               # x + out, 2x buffered
                + (bb * C * (halo + tt) * 4 if pad > 0 else 0)  # window scratch
                + 6 * blk * 4                                   # f32 temporaries
                + 2 * (C * kernel_size * 4 + C * C * mm_item + C * 4))

    # Shrink auto-chosen blocking if the estimate overruns the VMEM budget.
    if auto_bb or auto_tile:
        while est(batch_block, t_tile) + (4 << 20) > budget:
            if auto_bb and batch_block > 1:
                batch_block = max(d for d in range(1, batch_block) if B % d == 0)
            elif (auto_tile and t_tile % 256 == 0 and t_tile // 2 >= pad
                  and t_tile // 2 >= 128):
                t_tile //= 2
                num_t_tiles = T // t_tile
            else:
                break

    f32 = jnp.float32
    # Fold the identity residual into the last conv tap (exact).
    wconv_ck = wconv.reshape(C, kernel_size).astype(f32)
    wconv_ck = wconv_ck.at[:, kernel_size - 1].add(1.0)
    # Fold the conv bias through the linear: W@(y + b_c) + b = W@y + (b + W@b_c).
    blin_fold = (blin.astype(f32) + wlin.astype(f32) @ bconv.astype(f32)).reshape(C, 1)
    wlin_cast = wlin.astype(matmul_dtype)

    vmem_limit = int(min(max(est(batch_block, t_tile) + (4 << 20), 16 << 20), budget))

    win_shape = (batch_block, C, halo + t_tile) if pad > 0 else (1, 1, 128)

    kern = functools.partial(
        last_block_kernel,
        kernel_size=kernel_size, dilation=dilation, t_tile=t_tile, halo=halo,
        batch_block=batch_block, num_t_tiles=num_t_tiles, matmul_dtype=matmul_dtype,
    )

    # NOTE: the carried causal halo requires the time axis to stay innermost and
    # "arbitrary"; only the batch axis may be megacore-"parallel".
    # TODO(synk): constant-index weight blocks could be single-buffered via
    # pipeline_mode=pl.Buffered(1) to reclaim VMEM at very large C.
    return pl.pallas_call(
        kern,
        out_shape=jax.ShapeDtypeStruct((B, C, T), out_dtype),
        grid=(B // batch_block, num_t_tiles),
        in_specs=[
            pl.BlockSpec((batch_block, C, t_tile), lambda b, t: (b, 0, t)),
            pl.BlockSpec((C, kernel_size), lambda b, t: (0, 0)),
            pl.BlockSpec((C, C), lambda b, t: (0, 0)),
            pl.BlockSpec((C, 1), lambda b, t: (0, 0)),
        ],
        out_specs=pl.BlockSpec((batch_block, C, t_tile), lambda b, t: (b, 0, t)),
        scratch_shapes=[pltpu.VMEM(win_shape, jnp.float32)],
        compiler_params=pltpu.CompilerParams(
            dimension_semantics=("parallel", "arbitrary"),
            vmem_limit_bytes=vmem_limit,
        ),
    )(x, wconv_ck, wlin_cast, blin_fold)


def reference_forward(x, wconv, bconv, wlin, blin, *, kernel_size, dilation):
    """Pure-JAX reference of the PyTorch forward (for correctness checks)."""
    B, C, T = x.shape
    pad = (kernel_size - 1) * dilation
    xpad = jnp.pad(x, ((0, 0), (0, 0), (pad, 0)))   # causal left pad, NCT
    conv = bconv[None, :, None]
    for k in range(kernel_size):
        s = k * dilation
        conv = conv + wconv[:, 0, k][None, :, None] * xpad[:, :, s:s + T]
    y = jnp.transpose(conv + x, (0, 2, 1))           # (B, T, C)
    out = y @ jnp.transpose(wlin) + blin[None, None, :]
    return jnp.transpose(out, (0, 2, 1))             # (B, C, T)


if __name__ == "__main__":
    def make_inputs(key, B, C, T, K):
        kx, kw, kb, klw, klb = jax.random.split(key, 5)
        x = jax.random.normal(kx, (B, C, T), dtype=jnp.float32)
        wconv = 0.1 * jax.random.normal(kw, (C, 1, K), dtype=jnp.float32)
        bconv = 0.1 * jax.random.normal(kb, (C,), dtype=jnp.float32)
        wlin = 0.01 * jax.random.normal(klw, (C, C), dtype=jnp.float32)
        blin = 0.01 * jax.random.normal(klb, (C,), dtype=jnp.float32)
        return x, wconv, bconv, wlin, blin

    key = jax.random.PRNGKey(0)

    # Case 1: module-scale shapes (single full-T tile), exact f32 matmul.
    B, C, T, K, d = 2, 8, 16, 3, 2
    args = make_inputs(key, B, C, T, K)
    out = jax.block_until_ready(
        last_block_forward(*args, kernel_size=K, dilation=d,
                           matmul_dtype=jnp.float32))
    ref = reference_forward(*args, kernel_size=K, dilation=d)
    assert out.shape == (B, C, T)
    assert jnp.allclose(out, ref, atol=1e-5, rtol=1e-5), "f32 mismatch (case 1)"

    # Case 2: multi time-tile + fused batch block (carried causal halo + one
    # wide W @ (C, Bb*T_tile) matmul per step), exact f32 matmul.
    B2, C2, T2, K2, d2 = 4, 8, 512, 3, 4
    args2 = make_inputs(jax.random.PRNGKey(0), B2, C2, T2, K2)
    out2 = jax.block_until_ready(
        last_block_forward(*args2, kernel_size=K2, dilation=d2,
                           t_tile=256, batch_block=2, matmul_dtype=jnp.float32))
    ref2 = reference_forward(*args2, kernel_size=K2, dilation=d2)
    assert jnp.allclose(out2, ref2, atol=1e-5, rtol=1e-5), "f32 mismatch (case 2)"

    # Case 3: auto blocking with bf16 I/O and bf16 MXU operands (f32 accum).
    out3 = jax.block_until_ready(
        last_block_forward(*args2, kernel_size=K2, dilation=d2,
                           io_dtype=jnp.bfloat16))
    assert jnp.allclose(out3.astype(jnp.float32), ref2, atol=2e-2, rtol=2e-2), \
        "bf16 mismatch (case 3)"

    print("KERNEL_OK")
</pallas_src>

<mosaic_0001>
module attributes {stable_mosaic.version = 11 : i64} {
  func.func @last_block_kernel(%arg0: i32, %arg1: i32, %arg2: memref<1x8x16xf32, #tpu.memory_space<vmem>>, %arg3: memref<8x3xf32, #tpu.memory_space<vmem>>, %arg4: memref<8x8xf32, #tpu.memory_space<vmem>>, %arg5: memref<8x1xf32, #tpu.memory_space<vmem>>, %arg6: memref<1x8x16xf32, #tpu.memory_space<vmem>>, %arg7: memref<1x8x144xf32, #tpu.memory_space<vmem>>) attributes {dimension_semantics = [#tpu.dimension_semantics<parallel>, #tpu.dimension_semantics<arbitrary>], iteration_bounds = array<i64: 2, 1>, scalar_prefetch = 0 : i64, scratch_operands = 1 : i64, tpu.core_type = #tpu.core_type<tc>, window_params = [{transform_indices = @transform_0, window_bounds = array<i64: 1, 8, 16>}, {pipeline_mode = #tpu.pipeline_mode<synchronous>, transform_indices = @transform_1, window_bounds = array<i64: 8, 3>}, {pipeline_mode = #tpu.pipeline_mode<synchronous>, transform_indices = @transform_2, window_bounds = array<i64: 8, 8>}, {pipeline_mode = #tpu.pipeline_mode<synchronous>, transform_indices = @transform_3, window_bounds = array<i64: 8, 1>}, {transform_indices = @transform_4, window_bounds = array<i64: 1, 8, 16>}]} {
    %c0 = arith.constant 0 : index
    %c0_0 = arith.constant 0 : index
    %c0_1 = arith.constant 0 : index
    %0 = vector.load %arg2[%c0, %c0_0, %c0_1] : memref<1x8x16xf32, #tpu.memory_space<vmem>>, vector<1x8x16xf32>
    %c0_2 = arith.constant 0 : index
    %c0_3 = arith.constant 0 : index
    %1 = vector.load %arg3[%c0_2, %c0_3] : memref<8x3xf32, #tpu.memory_space<vmem>>, vector<8x3xf32>
    %c0_i32 = arith.constant 0 : i32
    %2 = arith.cmpi eq, %arg1, %c0_i32 : i32
    %3 = arith.extui %2 : i1 to i32
    %c0_i32_4 = arith.constant 0 : i32
    %4 = arith.cmpi ne, %3, %c0_i32_4 : i32
    scf.if %4 {
      %cst_21 = arith.constant 0.000000e+00 : f32
      %32 = vector.broadcast %cst_21 : f32 to vector<1x8x128xf32>
      %c0_22 = arith.constant 0 : index
      %c0_23 = arith.constant 0 : index
      %c0_24 = arith.constant 0 : index
      %33 = vector.load %arg7[%c0_22, %c0_23, %c0_24] : memref<1x8x144xf32, #tpu.memory_space<vmem>>, vector<1x8x128xf32>
      tpu.vector_store %arg7[%c0_22, %c0_23, %c0_24], %32 {strides = array<i32>} : memref<1x8x144xf32, #tpu.memory_space<vmem>>, vector<1x8x128xf32>,
    } else {
    }
    %c0_5 = arith.constant 0 : index
    %c0_6 = arith.constant 0 : index
    %c128 = arith.constant 128 : index
    %5 = vector.load %arg7[%c0_5, %c0_6, %c128] : memref<1x8x144xf32, #tpu.memory_space<vmem>>, vector<1x8x16xf32>
    tpu.vector_store %arg7[%c0_5, %c0_6, %c128], %0 {strides = array<i32>} : memref<1x8x144xf32, #tpu.memory_space<vmem>>, vector<1x8x16xf32>,
    %c0_7 = arith.constant 0 : index
    %c0_8 = arith.constant 0 : index
    %c124 = arith.constant 124 : index
    %6 = vector.load %arg7[%c0_7, %c0_8, %c124] : memref<1x8x144xf32, #tpu.memory_space<vmem>>, vector<1x8x16xf32>
    %7 = vector.extract_strided_slice %1 {offsets = [0, 0], sizes = [8, 1], strides = [1, 1]} : vector<8x3xf32> to vector<8x1xf32>
    %8 = vector.shape_cast %7 : vector<8x1xf32> to vector<1x8x1xf32>
    %9 = vector.broadcast %8 : vector<1x8x1xf32> to vector<1x8x16xf32>
    %10 = arith.mulf %6, %9 : vector<1x8x16xf32>
    %c0_9 = arith.constant 0 : index
    %c0_10 = arith.constant 0 : index
    %c126 = arith.constant 126 : index
    %11 = vector.load %arg7[%c0_9, %c0_10, %c126] : memref<1x8x144xf32, #tpu.memory_space<vmem>>, vector<1x8x16xf32>
    %12 = vector.extract_strided_slice %1 {offsets = [0, 1], sizes = [8, 1], strides = [1, 1]} : vector<8x3xf32> to vector<8x1xf32>
    %13 = vector.shape_cast %12 : vector<8x1xf32> to vector<1x8x1xf32>
    %14 = vector.broadcast %13 : vector<1x8x1xf32> to vector<1x8x16xf32>
    %15 = arith.mulf %11, %14 : vector<1x8x16xf32>
    %16 = arith.addf %10, %15 : vector<1x8x16xf32>
    %c0_11 = arith.constant 0 : index
    %c0_12 = arith.constant 0 : index
    %c128_13 = arith.constant 128 : index
    %17 = vector.load %arg7[%c0_11, %c0_12, %c128_13] : memref<1x8x144xf32, #tpu.memory_space<vmem>>, vector<1x8x16xf32>
    %18 = vector.extract_strided_slice %1 {offsets = [0, 2], sizes = [8, 1], strides = [1, 1]} : vector<8x3xf32> to vector<8x1xf32>
    %19 = vector.shape_cast %18 : vector<8x1xf32> to vector<1x8x1xf32>
    %20 = vector.broadcast %19 : vector<1x8x1xf32> to vector<1x8x16xf32>
    %21 = arith.mulf %17, %20 : vector<1x8x16xf32>
    %22 = arith.addf %16, %21 : vector<1x8x16xf32>
    %23 = vector.shape_cast %22 : vector<1x8x16xf32> to vector<8x16xf32>
    %c0_14 = arith.constant 0 : index
    %c0_15 = arith.constant 0 : index
    %24 = vector.load %arg4[%c0_14, %c0_15] : memref<8x8xf32, #tpu.memory_space<vmem>>, vector<8x8xf32>
    %cst = arith.constant dense<0.000000e+00> : vector<8x16xf32>
    %25 = tpu.matmul %24, %23, %cst {dimension_numbers = #tpu.dot_dimension_numbers<[1], [0], [0], [1], [0, 0, 1, 1], [], []>} : vector<8x8xf32>, vector<8x16xf32>, vector<8x16xf32> -> vector<8x16xf32>
    %c0_16 = arith.constant 0 : index
    %c0_17 = arith.constant 0 : index
    %26 = vector.load %arg5[%c0_16, %c0_17] : memref<8x1xf32, #tpu.memory_space<vmem>>, vector<8x1xf32>
    %27 = vector.broadcast %26 : vector<8x1xf32> to vector<8x16xf32>
    %28 = arith.addf %25, %27 : vector<8x16xf32>
    %c0_18 = arith.constant 0 : index
    %c0_19 = arith.constant 0 : index
    %c0_20 = arith.constant 0 : index
    %29 = vector.load %arg6[%c0_18, %c0_19, %c0_20] : memref<1x8x16xf32, #tpu.memory_space<vmem>>, vector<1x8x16xf32>
    %30 = vector.shape_cast %29 : vector<1x8x16xf32> to vector<8x16xf32>
    %31 = vector.shape_cast %28 : vector<8x16xf32> to vector<1x8x16xf32>
    tpu.vector_store %arg6[%c0_18, %c0_19, %c0_20], %31 {strides = array<i32>} : memref<1x8x16xf32, #tpu.memory_space<vmem>>, vector<1x8x16xf32>,
    return
  }
  func.func @transform_0(%arg0: i32, %arg1: i32) -> (i32, i32, i32) {
    %c0_i32 = arith.constant 0 : i32
    %c0_i32_0 = arith.constant 0 : i32
    return %arg0, %c0_i32, %arg1 : i32, i32, i32
  }
  func.func @transform_1(%arg0: i32, %arg1: i32) -> (i32, i32) {
    %c0_i32 = arith.constant 0 : i32
    %c0_i32_0 = arith.constant 0 : i32
    %c0_i32_1 = arith.constant 0 : i32
    return %c0_i32, %c0_i32_0 : i32, i32
  }
  func.func @transform_2(%arg0: i32, %arg1: i32) -> (i32, i32) {
    %c0_i32 = arith.constant 0 : i32
    %c0_i32_0 = arith.constant 0 : i32
    %c0_i32_1 = arith.constant 0 : i32
    return %c0_i32, %c0_i32_0 : i32, i32
  }
  func.func @transform_3(%arg0: i32, %arg1: i32) -> (i32, i32) {
    %c0_i32 = arith.constant 0 : i32
    %c0_i32_0 = arith.constant 0 : i32
    %c0_i32_1 = arith.constant 0 : i32
    return %c0_i32, %c0_i32_0 : i32, i32
  }
  func.func @transform_4(%arg0: i32, %arg1: i32) -> (i32, i32, i32) {
    %c0_i32 = arith.constant 0 : i32
    %c0_i32_0 = arith.constant 0 : i32
    return %arg0, %c0_i32, %arg1 : i32, i32, i32
  }
}

</mosaic_0001>

<bundles_post_ra>
// kernel: tpu_custom_call.1
= control target key start
LH: loop header
LB: loop body
LE: loop exit
PB: predicated region body
PF: predicated region fallthrough
CT: control target
= control target key end

     0   :  { %9 = vsyncpa [#allocation4], 0  ;;  %s765_s0 = inlined_call_operand.vmem [shape: f32[2,8,16], index: 0, kind: input, shape index: {}]   ;;  %s766_s1 = inlined_call_operand.vmem [shape: f32[8,3], index: 1, kind: input, shape index: {}]   ;;  %s767_s2 = inlined_call_operand.vmem [shape: f32[8,8], index: 2, kind: input, shape index: {}]   ;;  %s768_s3 = inlined_call_operand.vmem [shape: f32[8,1], index: 3, kind: input, shape index: {}]   ;;  %s769_s4 = inlined_call_operand.hbm [shape: f32[2,8,16], index: 4, kind: output, shape index: {}]  }
   0x1   :  { %11 = vsyncpa [#allocation4 + $0x1], 0  ;;  %s642_s15 = smov 0   ;;  %s644_s16 = smov 0  }
   0x2   :  { %s646_s17 = smov 0   ;;  %s648_s18 = smov 0  }
   0x3   :  { %s650_s19 = smov 0   ;;  %s652_s20 = smov 0  }
   0x4 LB: > { %s442_s21 = sadd.s32 4294967295, %s606_s20   ;;  %s443_s22 = sadd.s32 4294967294, %s606_s20   ;;  %s606_s20 = sphi %s652_s20, %s17_s20   ;;  %s602_s19 = sphi %s650_s19, %s776_s19   ;;  %s598_s18 = sphi %s648_s18, %s775_s18   ;;  %s594_s17 = sphi %s646_s17, %s774_s17   ;;  %s590_s16 = sphi %s644_s16, %s773_s16   ;;  %s586_s15 = sphi %s642_s15, %s772_s15  }
   0x5   : > { %s29_s23 = sadd.s32 1, %s602_s19  ;;  %s129_s24 = sadd.s32 1, %s594_s17 }
   0x6   : > { %p31_p0 = scmp.ge.s32.totalorder %s29_s23, 2  ;;  %p139_p1 = scmp.ne.s32.totalorder %s594_s17, %s590_s16 }
   0x7   : > { %p140_p2 = scmp.eq.s32.totalorder %s442_s21, 1  ;;  %p145_p3 = scmp.ne.s32.totalorder %s590_s16, %s586_s15 }
   0x8   : > { %s778_s23 = smov (%p31_p0, %s29_s23), 0  ;;  %p146_p5 = scmp.eq.s32.totalorder %s443_s22, 1 }
   0x9   : > { %p682_p4 = por %p140_p2, %p139_p1  ;;  %s124_s26 = ssub.s32 %s602_s19, %s778_s23 }
   0xa   : > { %p446_p6 = scmp.ge.s32.totalorder %s606_s20, 1  ;;  %p127_p7 = scmp.eq.s32.totalorder %s124_s26, 0 }
   0xb   : > { %p689_p8 = por %p146_p5, %p145_p3  ;;  %p183_p9 = scmp.lt.s32.totalorder %s606_s20, 3 }
   0xc   : > { %s695_s28 = scalar_select %p127_p7, %s594_s17, %s129_s24  }
   0xd   : > { %p184_p10 = pnand %p446_p6, %p183_p9 }
   0xe   : > { %v219_v0 = vld [vmem:[%s766_s1] sm:$0xff] (!%p184_p10)  ;;  %p211_p11 = scmp.lt.s32.totalorder (!%p184_p10), %s598_s18, 1  ;;  %v608_v1 = vmov (!%p184_p10), 1   ;;  %v609_v2 = vmov (!%p184_p10), 0   ;;  %v610_v3 = vmov (!%p184_p10), 0.0   ;;  %vm225_vm0 = vcmask (!%p184_p10), 130048  }
   0xf   : > { %187 = sbr.rel (%p184_p10) target bundleno = 615 (0x267), region = 36  ;;  %524 = vset.pattern.permute.xlu0 (!%p184_p10), %v608_v1  ;;  %526 = vset.pattern.permute.xlu1 (!%p184_p10), %v609_v2  ;;  %v611_v4 = vmov (!%p184_p10), 2   ;;  %s612_s10 = smov (!%p184_p10), 126   ;;  %vm614_vm1 = vmmov (!%p184_p10), 0   ;;  %vm248_vm2 = vcmask (!%p184_p10), 1031168   ;;  %v266_v23 = vld [vmem:[%s768_s3] sm:$0xff] (!%p184_p10) }
  0x10   : > { %237 = vperm.xlu0 (!%p184_p10), %524, %v219_v0   ;;  %231 = vperm.xlu1 (!%p184_p10), %526, %v219_v0   ;;  %s613_s11 = smov (!%p184_p10), 124   ;;  %s615_s12 = smov (!%p184_p10), 4   ;;  %vm278_vm3 = vcmask (!%p184_p10), 31744   ;;  %v265_v26 = vld [vmem:[%s767_s2] sm:$0xff] (!%p184_p10)  ;;  %vm281_vm4 = vcmask (!%p184_p10), 64512  }
  0x11   : > { %456 = vmatprep.subr.mxu0 (!%p184_p10), %v610_v3  ;;  %458 = vmatprep.mubr.msk.f32.mxu0 (!%p184_p10), %vm614_vm1, %v610_v3  ;;  %s208_s24 = sand.u32 (!%p184_p10), 1, %s590_s16   ;;  %s451_s29 = sshll.u32 (!%p184_p10), %s598_s18, 7 }
  0x12   : > { %s447_s26 = sshll.u32 (!%p184_p10), %s208_s24, 3  ;;  %s717_s8 = scalar_lea.hbm (!%p184_p10), %s769_s4, %s451_s29 }
  0x13   : > { %s210_s30 = scalar_lea.vmem (!%p184_p10), [#allocation3], %s447_s26 }
  0x14   : > { %525 = vset.pattern.permute.xlu0 (!%p184_p10), %v611_v4 }
  0x15   : > { %255 = vperm.xlu0 (!%p184_p10), %525, %v219_v0  }
  0x16   : > { %s212_s5 = scalar_select %p211_p11, %s598_s18, 1 }
  0x18   : > { %s448_s6 = sshll.u32 %s212_s5, 3  ;;  %s371_s5 = sshll.u32 %s210_s30, 4  ;;  %s719_s5 = int_to_ptr.vmem [resolvable:$true] %s371_s5 }
  0x19   : > { %s217_s9 = scalar_lea.vmem %s765_s0, %s448_s6  ;;  %527 = vset.pattern.permute.xlu0 %v609_v2  ;;  %s528_s18 = scalar_lea.vmem %s719_s5, 128 }
  0x1a   : > { %v218_v5 = vld [vmem:[%s217_s9] sm:$0xff]  ;;  %s357_s9 = scalar_lea.sflag [#allocation4], %s208_s24  ;;  %p529_p12 = scmp.ne.s32.totalorder %s719_s5, %s528_s18 }
  0x1b   : > { %226 = vst.msk [vmem:[#allocation2 + $0x8] sm:$0xff] %vm225_vm0, %v218_v5 }
  0x1c   : > { %p530_p13 = pnand %p529_p12, %p682_p4 }
  0x1e   : > { %p531_p0 = pneg %p530_p13 }
  0x22   : > { %v228_v8 = vld [vmem:[#allocation2 + $0x8] sm:$0xff] }
  0x8f   : > { %v238_v6 = vpop.permute.xlu0 %237  ;;  %v232_v12 = vpop.permute.xlu1 %231 }
  0x90   : > { %v240_v7 = vmul.f32 0.0, %v238_v6  ;;  %v241_v9 = vmul.f32 %v238_v6, %v228_v8  ;;  %v235_v14 = vmul.f32 %v232_v12, %v228_v8  ;;  %v234_v15 = vmul.f32 0.0, %v232_v12 }
  0x92   : > { %244 = vrot.lane.b32.xlu1 %v240_v7, %s612_s10 }
  0x94   : > { %v256_v10 = vpop.permute.xlu0 %255 }
  0x95   : > { %v258_v11 = vmul.f32 %v256_v10, %v228_v8 }
  0x96   : > { %246 = vrot.lane.b32.xlu1 %v241_v9, %s612_s10  ;;  %s616_s10 = smov [#allocation3]  }
  0x97   : > { %260 = vrot.lane.b32.xlu0 %v258_v11, %s613_s11  ;;  %s532_s11 = sshll.u32 %s616_s10, 4  ;;  %s533_s11 = int_to_ptr.vmem [resolvable:$false] %s532_s11 }
  0x98   : > { %p535_p1 = scmp.lt.s32.totalorder %s719_s5, %s533_s11 }
 0x104   : > { %v245_v13 = vpop.permute.xlu1 %244 }
 0x108   : > { %v247_v16 = vpop.permute.xlu1 %246 }
 0x109   : > { %v249_v17 = vsel %vm248_vm2, %v245_v13, %v247_v16  ;;  %v253_v18 = vadd.f32 %v247_v16, %v235_v14  ;;  %v261_v19 = vpop.permute.xlu0 %260 }
 0x10a   : > { %v252_v20 = vadd.f32 %v249_v17, %v234_v15 }
 0x10b   : > { %v264_v21 = vadd.f32 %v261_v19, %v253_v18 }
 0x10c   : > { %v263_v22 = vadd.f32 %v261_v19, %v252_v20 }
 0x10d   : > { %276 = vrot.lane.b32.xlu0 %v264_v21, %s615_s12 }
 0x10e   : > { %274 = vrot.lane.b32.xlu1 %v263_v22, %s615_s12  ;;  %s534_s12 = scalar_lea.vmem %s533_s11, 256 }
 0x10f   : > { %p536_p2 = scmp.lt.s32.totalorder %s534_s12, %s528_s18 }
 0x111   : > { %p537_p3 = por %p536_p2, %p535_p1 }
 0x112   : > { %269 = vperm.xlu1 %526, %v266_v23  }
 0x113   : > { %p538_p5 = pnand %p537_p3, %p531_p0 }
 0x17f   : > { %v277_v24 = vpop.permute.xlu0 %276 }
 0x180   : > { %v275_v25 = vpop.permute.xlu1 %274 }
 0x181   : > { %v279_v27 = vsel %vm278_vm3, %v275_v25, %v277_v24 }
 0x182   : > { %457 = vmatpush3.msra.mxu0 %v279_v27 }
 0x183   : > { %459 = vmatmul.mubr.msk.f32.vlgmr.msra.gmra.mrb[0].mxu0 %vm281_vm4, %v265_v26 }
 0x191   : > { %v270_v28 = vpop.permute.xlu1 %269 }
 0x256   : > { %v351_v29 = vpop.f32.mrb[0].mxu0 }
 0x257   : > { %v352_v30 = vadd.f32 %v351_v29, %v270_v28  ;;  %v460_v31 = vpop.f32.mrb[1].mxu0 }
 0x259   : > { %355 = vst.msk [vmem:[%s210_s30] sm:$0xff] %vm225_vm0, %v352_v30 }
 0x25a   : > { %541 = shalt.err (!%p538_p5)
}
 0x25b   : > { %s542_s13 = scalar_lea.hbm %s717_s8, 128  ;;  %s546_s22 = scalar_lea.hbm %s769_s4, 256 }
 0x25c   : > { %p543_p6 = scmp.ne.s32.totalorder %s717_s8, %s542_s13  ;;  %p547_p10 = scmp.lt.u32.totalorder %s717_s8, %s769_s4 }
 0x25d   : > { %p548_p11 = scmp.lt.u32.totalorder %s546_s22, %s542_s13  ;;  %p550_p13 = scmp.lt.u32.totalorder %s542_s13, %s717_s8 }
 0x25e   : > { %p544_p7 = pnand %p543_p6, %p682_p4 }
 0x25f   : > { %p549_p12 = por %p548_p11, %p547_p10 }
 0x260   : > { %p545_p9 = pneg %p544_p7 }
 0x261   : > { %p551_p0 = por %p550_p13, %p549_p12 }
 0x263   : > { %p552_p1 = pnand %p551_p0, %p545_p9 }
 0x265   : > { %555 = shalt.err (!%p552_p1)
}
 0x266   : > { %461 = dma.vmem_to_hbm [thread:$0]  (%p682_p4), %s719_s5, 128, %s717_s8, %s357_s9  }
 0x267 PF: > { %p467_p2 = scmp.ge.s32.totalorder %s606_s20, 2  ;;  %s383_s29 = sand.u32 1, %s586_s15  }
 0x268   : > { %s384_s30 = scalar_lea.sflag [#allocation4], %s383_s29 }
 0x269   : > { %p464_p3 = pnand %p467_p2, %p689_p8 }
 0x26b   : > { %581 = dma.done.wait (!%p464_p3), %s384_s30, 128  }
 0x26c   : > { %583 = vsyncadd (!%p464_p3), %s384_s30, 4294967168  ;;  %s17_s20 = sadd.s32 1, %s606_s20   ;;  %s772_s15 = smov %s590_s16 }
 0x26d   : > { %p14_p5 = scmp.ge.s32.totalorder %s17_s20, 4   ;;  %s773_s16 = smov %s594_s17 }
 0x26e   : > { %s774_s17 = smov %s695_s28  ;;  %s775_s18 = smov %s602_s19 }
 0x26f   : > { %s776_s19 = smov %s778_s23  ;;  %16 = sbr.rel (!%p14_p5) target bundleno = 4 (0x4), region = 75 }
 0x276   :  { %389 = vsyncpa [#allocation4], 1 }
 0x277   :  { %391 = vsyncpa [#allocation4 + $0x1], 1 }

</bundles_post_ra>
